<compile_context>
chip_gen: v5e
topology: v5e:2x2
jax: 0.10.0
libtpu: 0.0.40
codegen_flags: <defaults>
</compile_context>

<pallas_src>
import functools
import math

import jax
import jax.numpy as jnp
from jax.experimental import pallas as pl
from jax.experimental.pallas import tpu as pltpu

_LANE = 128


def _layernorm_kernel(x_ref, gamma_ref, beta_ref, o_ref, *, eps, inv_n):
    """Plain path: rows independent, normalize over the last (lane) axis."""
    x = x_ref[...].astype(jnp.float32)
    mean = jnp.sum(x, axis=-1, keepdims=True) * inv_n
    # Biased variance; (x - mean) is recomputed at the output instead of keeping
    # a full-block `centered` temporary live across the reduction.
    var = jnp.sum((x - mean) * (x - mean), axis=-1, keepdims=True) * inv_n
    inv_std = jax.lax.rsqrt(var + eps)
    gamma = gamma_ref[...].astype(jnp.float32)
    beta = beta_ref[...].astype(jnp.float32)
    o_ref[...] = ((x - mean) * inv_std * gamma + beta).astype(o_ref.dtype)


def _layernorm_folded_kernel(x_ref, gamma_ref, beta_ref, pool_ref, o_ref, *, eps, inv_n):
    """Lane-folded path: k original rows packed along the lane axis.

    pool is the (cols, cols) block-diagonal ones matrix; dot(x, pool) yields the
    per-original-row sums already broadcast back to every lane of that row.
    The MXU has full slack in this HBM-bound kernel, so the matmuls are free.
    """
    x = x_ref[...].astype(jnp.float32)
    pool = pool_ref[...]
    mean = jnp.dot(x, pool, preferred_element_type=jnp.float32) * inv_n
    d = x - mean
    var = jnp.dot(d * d, pool, preferred_element_type=jnp.float32) * inv_n
    inv_std = jax.lax.rsqrt(var + eps)
    gamma = gamma_ref[...].astype(jnp.float32)
    beta = beta_ref[...].astype(jnp.float32)
    o_ref[...] = ((x - mean) * inv_std * gamma + beta).astype(o_ref.dtype)


def _tpu_vmem_and_cores():
    """Physical VMEM bytes and TensorCore count (best-effort, safe fallbacks)."""
    vmem_cap = 64 << 20  # conservative (v7x per-TC sized) fallback
    num_cores = 1
    try:
        info = pltpu.get_tpu_info()
        vmem_cap = int(info.vmem_capacity_bytes)
        cores = None
        for attr in ("num_tensorcores", "num_cores", "core_count"):
            val = getattr(info, attr, None)
            if isinstance(val, int) and val > 0:
                cores = val
                break
        if cores is None:
            # Heuristic: 64 MiB-per-core VMEM parts (v7x) carry 2 TensorCores/chip.
            cores = 2 if vmem_cap <= (64 << 20) else 1
        num_cores = cores
    except Exception:
        pass
    return vmem_cap, num_cores


def _sublane_multiple(itemsize):
    # f32 packs 8 rows/vreg, bf16/f16 pack 16, 8-bit dtypes pack 32.
    return 8 if itemsize >= 4 else (16 if itemsize == 2 else 32)


def _fit_tile_rows(rows, total_rows, mult):
    if rows >= total_rows:
        return total_rows  # full-dim block (exempt from the sublane-multiple rule)
    return max(mult, (rows // mult) * mult)


def _choose_tile_rows(total_rows, row_elems, in_isz, out_isz, vmem_cap, num_cores, mult):
    # Working-set budget for the pipelined block (footprint incl. temporaries).
    budget = min(vmem_cap // 2, 48 << 20)
    # Per-row footprint: input + output blocks double-buffered plus ~2 f32
    # full-block temporaries (the f32 upcast of x and one intermediate).
    ws_per_row = row_elems * (2 * (in_isz + out_isz) + 8)
    rows_by_vmem = max(1, budget // max(ws_per_row, 1))

    # DMA-efficiency target: ~4 MiB of input per block buffer. >=1-2 MiB blocks
    # keep the ~0.35us per-grid-step overhead negligible; >8 MiB buys nothing.
    rows_by_dma = max(1, (4 << 20) // max(row_elems * in_isz, 1))

    rows = min(rows_by_vmem, rows_by_dma)

    # Only force a multi-step grid when the chip actually has >1 TensorCore
    # (v7x); there, prefer >=4 steps so the ragged tail balances across cores.
    if num_cores > 1:
        rows = min(rows, max(mult, -(-total_rows // (2 * num_cores))))

    return _fit_tile_rows(rows, total_rows, mult)


def custom_layer_norm(x, gamma, beta, eps=1e-5, *, tile_rows=None):
    """LayerNorm over axis 1 of a (n_batch, n_neurons) array. gamma/beta: (n_neurons,)."""
    if x.ndim != 2:
        raise ValueError("input must be (n_batch, n_neurons)")
    n_batch, n_neurons = x.shape
    if gamma.shape != (n_neurons,) or beta.shape != (n_neurons,):
        raise ValueError("The shape of the input tensor should match the number of neurons")

    vmem_cap, num_cores = _tpu_vmem_and_cores()
    in_isz = out_isz = x.dtype.itemsize
    mult = _sublane_multiple(in_isz)

    # Lane-folding fast path for narrow feature widths: pack k rows along the
    # lane axis so every load/store is lane-dense. Restricted to small folded
    # widths (<=256 lanes) so the pooling matmul stays far below the roofline,
    # and to batches divisible by k (otherwise fall back to the plain path).
    use_fold = False
    k = 1
    cols = n_neurons
    if n_neurons < _LANE:
        k = _LANE // math.gcd(n_neurons, _LANE)
        cols = k * n_neurons
        use_fold = (k > 1) and (cols <= 256) and (n_batch % k == 0)

    if use_fold:
        n_groups = n_batch // k
        x_in = x.reshape(n_groups, cols)  # contiguous -> free reinterpret
        gamma_in = jnp.tile(gamma, k).reshape(1, cols)
        beta_in = jnp.tile(beta, k).reshape(1, cols)
        pool = jnp.kron(jnp.eye(k, dtype=jnp.float32),
                        jnp.ones((n_neurons, n_neurons), jnp.float32))
        total_rows, row_elems = n_groups, cols
    else:
        # Note: when n_neurons < 128 and the fold conditions fail, this path runs
        # with partially-masked lanes (a fraction of HBM roofline) but is correct.
        x_in = x
        gamma_in = gamma.reshape(1, n_neurons)
        beta_in = beta.reshape(1, n_neurons)
        total_rows, row_elems = n_batch, n_neurons

    if tile_rows is None:
        tile_rows = _choose_tile_rows(total_rows, row_elems, in_isz, out_isz,
                                      vmem_cap, num_cores, mult)
    else:
        tile_rows = _fit_tile_rows(int(tile_rows), total_rows, mult)

    # TODO(synk): for extremely wide rows (hundreds of K neurons) even `mult` rows
    # overflow VMEM; that case needs a neuron-axis grid with partial-stat scratch.

    # Scoped-VMEM limit from the corrected working set (blocks + f32 temporaries
    # + small constant params), clamped under physical capacity. This matters
    # most on v5e, whose default scoped VMEM is only 16 MiB.
    working_set = tile_rows * row_elems * (2 * (in_isz + out_isz) + 8)
    const_bytes = 4 * row_elems * 2 * 4  # gamma/beta, double-buffered, f32-sized
    if use_fold:
        const_bytes += 2 * cols * cols * 4  # pooling matrix
    vmem_limit = min(int(vmem_cap * 0.9),
                     max(32 << 20, working_set + const_bytes + (8 << 20)))

    grid = (pl.cdiv(total_rows, tile_rows),)  # ragged last block handled by masking
    row_spec = pl.BlockSpec((tile_rows, row_elems), lambda i: (i, 0))
    vec_spec = pl.BlockSpec((1, row_elems), lambda i: (0, 0))

    if use_fold:
        kernel = functools.partial(_layernorm_folded_kernel,
                                   eps=float(eps), inv_n=1.0 / n_neurons)
        in_specs = [row_spec, vec_spec, vec_spec,
                    pl.BlockSpec((cols, cols), lambda i: (0, 0))]
        args = (x_in, gamma_in, beta_in, pool)
    else:
        kernel = functools.partial(_layernorm_kernel,
                                   eps=float(eps), inv_n=1.0 / n_neurons)
        in_specs = [row_spec, vec_spec, vec_spec]
        args = (x_in, gamma_in, beta_in)

    out = pl.pallas_call(
        kernel,
        out_shape=jax.ShapeDtypeStruct((total_rows, row_elems), x.dtype),
        grid_spec=pl.GridSpec(grid=grid, in_specs=in_specs, out_specs=row_spec),
        compiler_params=pltpu.CompilerParams(
            dimension_semantics=("parallel",),
            vmem_limit_bytes=int(vmem_limit),
        ),
    )(*args)

    return out.reshape(n_batch, n_neurons) if use_fold else out


def _reference_layer_norm(x, gamma, beta, eps=1e-5):
    mean = jnp.mean(x, axis=1, keepdims=True)
    var = jnp.mean((x - mean) ** 2, axis=1, keepdims=True)  # unbiased=False
    normalized = (x - mean) / jnp.sqrt(var + eps)
    return gamma * normalized + beta


if __name__ == "__main__":
    key = jax.random.PRNGKey(0)

    # Small demo shape consistent with the module's (n_batch, n_neurons) forward.
    # n_neurons=32 (<128) exercises the lane-folded path.
    n_batch, n_neurons = 8, 32
    x = jax.random.normal(key, (n_batch, n_neurons), dtype=jnp.float32)

    # Deterministic parameter init, matching nn.Parameter(torch.ones/zeros).
    gamma = jnp.ones((n_neurons,), dtype=jnp.float32)
    beta = jnp.zeros((n_neurons,), dtype=jnp.float32)

    out = jax.block_until_ready(custom_layer_norm(x, gamma, beta, eps=1e-5))
    ref = _reference_layer_norm(x, gamma, beta, eps=1e-5)
    assert out.shape == (n_batch, n_neurons)
    assert jnp.allclose(out, ref, atol=1e-5, rtol=1e-5)

    # Ragged batch that is not divisible by the fold factor -> plain path.
    n_batch2 = 13
    x2 = jax.random.normal(jax.random.PRNGKey(1), (n_batch2, n_neurons), dtype=jnp.float32)
    out2 = jax.block_until_ready(custom_layer_norm(x2, gamma, beta, eps=1e-5))
    ref2 = _reference_layer_norm(x2, gamma, beta, eps=1e-5)
    assert out2.shape == (n_batch2, n_neurons)
    assert jnp.allclose(out2, ref2, atol=1e-5, rtol=1e-5)

    # Lane-dense (>=128 neurons) plain path.
    n_batch3, n_neurons3 = 16, 256
    x3 = jax.random.normal(jax.random.PRNGKey(2), (n_batch3, n_neurons3), dtype=jnp.float32)
    gamma3 = jnp.ones((n_neurons3,), dtype=jnp.float32)
    beta3 = jnp.zeros((n_neurons3,), dtype=jnp.float32)
    out3 = jax.block_until_ready(custom_layer_norm(x3, gamma3, beta3, eps=1e-5))
    ref3 = _reference_layer_norm(x3, gamma3, beta3, eps=1e-5)
    assert out3.shape == (n_batch3, n_neurons3)
    assert jnp.allclose(out3, ref3, atol=1e-5, rtol=1e-5)

    print("KERNEL_OK")
</pallas_src>

<mosaic_0001>
module attributes {stable_mosaic.version = 11 : i64} {
  func.func @_layernorm_folded_kernel(%arg0: i32, %arg1: memref<2x128xf32, #tpu.memory_space<vmem>>, %arg2: memref<1x128xf32, #tpu.memory_space<vmem>>, %arg3: memref<1x128xf32, #tpu.memory_space<vmem>>, %arg4: memref<128x128xf32, #tpu.memory_space<vmem>>, %arg5: memref<2x128xf32, #tpu.memory_space<vmem>>) attributes {dimension_semantics = [#tpu.dimension_semantics<parallel>], iteration_bounds = array<i64: 1>, scalar_prefetch = 0 : i64, scratch_operands = 0 : i64, tpu.core_type = #tpu.core_type<tc>, window_params = [{transform_indices = @transform_0, window_bounds = array<i64: 2, 128>}, {pipeline_mode = #tpu.pipeline_mode<synchronous>, transform_indices = @transform_1, window_bounds = array<i64: 1, 128>}, {pipeline_mode = #tpu.pipeline_mode<synchronous>, transform_indices = @transform_2, window_bounds = array<i64: 1, 128>}, {pipeline_mode = #tpu.pipeline_mode<synchronous>, transform_indices = @transform_3, window_bounds = array<i64: 128, 128>}, {transform_indices = @transform_4, window_bounds = array<i64: 2, 128>}]} {
    %c0 = arith.constant 0 : index
    %c0_0 = arith.constant 0 : index
    %0 = vector.load %arg1[%c0, %c0_0] : memref<2x128xf32, #tpu.memory_space<vmem>>, vector<2x128xf32>
    %c0_1 = arith.constant 0 : index
    %c0_2 = arith.constant 0 : index
    %1 = vector.load %arg4[%c0_1, %c0_2] : memref<128x128xf32, #tpu.memory_space<vmem>>, vector<128x128xf32>
    %cst = arith.constant dense<0.000000e+00> : vector<2x128xf32>
    %2 = tpu.matmul %0, %1, %cst {dimension_numbers = #tpu.dot_dimension_numbers<[1], [0], [0], [1], [0, 0, 1, 1], [], []>} : vector<2x128xf32>, vector<128x128xf32>, vector<2x128xf32> -> vector<2x128xf32>
    %cst_3 = arith.constant 3.125000e-02 : f32
    %3 = vector.broadcast %cst_3 : f32 to vector<2x128xf32>
    %4 = arith.mulf %2, %3 : vector<2x128xf32>
    %5 = arith.subf %0, %4 : vector<2x128xf32>
    %6 = arith.mulf %5, %5 : vector<2x128xf32>
    %cst_4 = arith.constant dense<0.000000e+00> : vector<2x128xf32>
    %7 = tpu.matmul %6, %1, %cst_4 {dimension_numbers = #tpu.dot_dimension_numbers<[1], [0], [0], [1], [0, 0, 1, 1], [], []>} : vector<2x128xf32>, vector<128x128xf32>, vector<2x128xf32> -> vector<2x128xf32>
    %cst_5 = arith.constant 3.125000e-02 : f32
    %8 = vector.broadcast %cst_5 : f32 to vector<2x128xf32>
    %9 = arith.mulf %7, %8 : vector<2x128xf32>
    %cst_6 = arith.constant 9.99999974E-6 : f32
    %10 = vector.broadcast %cst_6 : f32 to vector<2x128xf32>
    %11 = arith.addf %9, %10 : vector<2x128xf32>
    %12 = math.rsqrt %11 : vector<2x128xf32>
    %c0_7 = arith.constant 0 : index
    %c0_8 = arith.constant 0 : index
    %13 = vector.load %arg2[%c0_7, %c0_8] : memref<1x128xf32, #tpu.memory_space<vmem>>, vector<1x128xf32>
    %c0_9 = arith.constant 0 : index
    %c0_10 = arith.constant 0 : index
    %14 = vector.load %arg3[%c0_9, %c0_10] : memref<1x128xf32, #tpu.memory_space<vmem>>, vector<1x128xf32>
    %15 = arith.subf %0, %4 : vector<2x128xf32>
    %16 = arith.mulf %15, %12 : vector<2x128xf32>
    %17 = vector.broadcast %13 : vector<1x128xf32> to vector<2x128xf32>
    %18 = arith.mulf %16, %17 : vector<2x128xf32>
    %19 = vector.broadcast %14 : vector<1x128xf32> to vector<2x128xf32>
    %20 = arith.addf %18, %19 : vector<2x128xf32>
    %c0_11 = arith.constant 0 : index
    %c0_12 = arith.constant 0 : index
    %21 = vector.load %arg5[%c0_11, %c0_12] : memref<2x128xf32, #tpu.memory_space<vmem>>, vector<2x128xf32>
    tpu.vector_store %arg5[%c0_11, %c0_12], %20 {strides = array<i32>} : memref<2x128xf32, #tpu.memory_space<vmem>>, vector<2x128xf32>,
    return
  }
  func.func @transform_0(%arg0: i32) -> (i32, i32) {
    %c0_i32 = arith.constant 0 : i32
    %c0_i32_0 = arith.constant 0 : i32
    return %arg0, %c0_i32 : i32, i32
  }
  func.func @transform_1(%arg0: i32) -> (i32, i32) {
    %c0_i32 = arith.constant 0 : i32
    %c0_i32_0 = arith.constant 0 : i32
    %c0_i32_1 = arith.constant 0 : i32
    return %c0_i32, %c0_i32_0 : i32, i32
  }
  func.func @transform_2(%arg0: i32) -> (i32, i32) {
    %c0_i32 = arith.constant 0 : i32
    %c0_i32_0 = arith.constant 0 : i32
    %c0_i32_1 = arith.constant 0 : i32
    return %c0_i32, %c0_i32_0 : i32, i32
  }
  func.func @transform_3(%arg0: i32) -> (i32, i32) {
    %c0_i32 = arith.constant 0 : i32
    %c0_i32_0 = arith.constant 0 : i32
    %c0_i32_1 = arith.constant 0 : i32
    return %c0_i32, %c0_i32_0 : i32, i32
  }
  func.func @transform_4(%arg0: i32) -> (i32, i32) {
    %c0_i32 = arith.constant 0 : i32
    %c0_i32_0 = arith.constant 0 : i32
    return %arg0, %c0_i32 : i32, i32
  }
}

</mosaic_0001>

<bundles_post_ra>
// kernel: tpu_custom_call.1
= control target key start
LH: loop header
LB: loop body
LE: loop exit
PB: predicated region body
PF: predicated region fallthrough
CT: control target
= control target key end

     0   :  { %9 = vsyncpa [#allocation3], 0  ;;  %s321_s0 = inlined_call_operand.hbm [shape: f32[2,128], index: 0, kind: input, shape index: {}]   ;;  %s322_s1 = inlined_call_operand.hbm [shape: f32[1,128], index: 1, kind: input, shape index: {}]   ;;  %s323_s2 = inlined_call_operand.vmem [shape: f32[1,128], index: 2, kind: input, shape index: {}]   ;;  %s324_s3 = inlined_call_operand.hbm [shape: f32[128,128], index: 3, kind: input, shape index: {}]   ;;  %s325_s4 = inlined_call_operand.hbm [shape: f32[2,128], index: 4, kind: output, shape index: {}]  }
   0x1   :  { %10 = vsyncpa [#allocation6], 0  ;;  %s28_s17 = sshll.u32 %s322_s1, 4  ;;  %s29_s17 = int_to_ptr.hbm [resolvable:$true] %s28_s17 }
   0x2   :  { %11 = vsyncpa [#allocation4], 0  ;;  %s275_s18 = smov [#allocation5]   ;;  %s17_s22 = sshll.u32 %s321_s0, 4  ;;  %s18_s22 = int_to_ptr.hbm [resolvable:$true] %s17_s22 }
   0x3   :  { %s30_s19 = sshll.u32 %s275_s18, 4  ;;  %s276_s23 = smov [#allocation2]   ;;  %s31_s19 = int_to_ptr.vmem [resolvable:$true] %s30_s19 }
   0x4   :  { %33 = dma.hbm_to_vmem [thread:$0]  %s29_s17, 16, %s31_s19, [#allocation6]  }
   0x5   :  { %s19_s24 = sshll.u32 %s276_s23, 4  ;;  %s40_s27 = sshll.u32 %s324_s3, 4  ;;  %s20_s24 = int_to_ptr.vmem [resolvable:$true] %s19_s24  ;;  %s41_s27 = int_to_ptr.hbm [resolvable:$true] %s40_s27 }
   0x6   :  { %22 = dma.hbm_to_vmem [thread:$0]  %s18_s22, 32, %s20_s24, [#allocation3]  }
   0x7   :  { %s277_s1 = smov [#allocation7]   ;;  %s278_s29 = smov 128  }
   0x8   :  { %s42_s28 = sshll.u32 %s277_s1, 4  ;;  %s279_s30 = smov 8   ;;  %s43_s28 = int_to_ptr.vmem [resolvable:$true] %s42_s28 }
   0x9   :  { %48 = dma.hbm_to_vmem [thread:$0]  %s41_s27, 2048, %s43_s28, [#allocation6], %s278_s29, %s278_s29, %s279_s30  }
   0xa   :  { %269 = dma.done.wait [#allocation3], 32  }
   0xb   :  { %270 = vsyncadd [#allocation3], 4294967264 }
   0xc   :  { %271 = dma.done.wait [#allocation6], 2064  }
   0xd   :  { %272 = vsyncadd [#allocation6], 4294965232  ;;  %v77_v0 = vld [vmem:[#allocation7 + $0x78] sm:$0xff]  ;;  %v76_v1 = vld [vmem:[#allocation7 + $0x70] sm:$0xff]  ;;  %s280_s5 = smov [#allocation8]   ;;  %s152_s9 = sshll.u32 %s325_s4, 4  ;;  %s153_s9 = int_to_ptr.hbm [resolvable:$true] %s152_s9 }
   0xe   :  { %78 = vmatpush.msra.mxu0 %v77_v0  ;;  %101 = vmatpush.msra.mxu1 %v77_v0  ;;  %v75_v2 = vld [vmem:[#allocation7 + $0x68] sm:$0xff]  ;;  %v74_v3 = vld [vmem:[#allocation7 + $0x60] sm:$0xff]  ;;  %v73_v4 = vld [vmem:[#allocation7 + $0x58] sm:$0xff]  ;;  %s150_s6 = sshll.u32 %s280_s5, 4  ;;  %s151_s6 = int_to_ptr.vmem [resolvable:$true] %s150_s6 }
   0xf   :  { %v72_v5 = vld [vmem:[#allocation7 + $0x50] sm:$0xff]  ;;  %v71_v6 = vld [vmem:[#allocation7 + $0x48] sm:$0xff]  ;;  %v70_v7 = vld [vmem:[#allocation7 + $0x40] sm:$0xff] }
  0x10   :  { %79 = vmatpush.msra.mxu0 %v76_v1  ;;  %102 = vmatpush.msra.mxu1 %v76_v1  ;;  %v69_v8 = vld [vmem:[#allocation7 + $0x38] sm:$0xff]  ;;  %v68_v9 = vld [vmem:[#allocation7 + $0x30] sm:$0xff]  ;;  %v67_v10 = vld [vmem:[#allocation7 + $0x28] sm:$0xff] }
  0x11   :  { %v66_v11 = vld [vmem:[#allocation7 + $0x20] sm:$0xff]  ;;  %v65_v12 = vld [vmem:[#allocation7 + $0x18] sm:$0xff]  ;;  %v64_v13 = vld [vmem:[#allocation7 + $0x10] sm:$0xff] }
  0x12   :  { %80 = vmatpush.msra.mxu0 %v75_v2  ;;  %103 = vmatpush.msra.mxu1 %v75_v2  ;;  %v63_v14 = vld [vmem:[#allocation7 + $0x8] sm:$0xff]  ;;  %v62_v15 = vld [vmem:[#allocation7] sm:$0xff]  ;;  %v61_v16 = vld [vmem:[#allocation2] sm:$0x3] }
  0x13   :  { %v169_v30 = vld [vmem:[#allocation5] ss:$0 sm:$0xff]  ;;  %v170_v33 = vld [vmem:[%s323_s2] ss:$0 sm:$0xff] }
  0x14   :  { %81 = vmatpush.msra.mxu0 %v74_v3  ;;  %104 = vmatpush.msra.mxu1 %v74_v3 }
  0x16   :  { %82 = vmatpush.msra.mxu0 %v73_v4  ;;  %105 = vmatpush.msra.mxu1 %v73_v4 }
  0x18   :  { %83 = vmatpush.msra.mxu0 %v72_v5  ;;  %106 = vmatpush.msra.mxu1 %v72_v5 }
  0x1a   :  { %84 = vmatpush.msra.mxu0 %v71_v6  ;;  %107 = vmatpush.msra.mxu1 %v71_v6 }
  0x1c   :  { %85 = vmatpush.msra.mxu0 %v70_v7  ;;  %108 = vmatpush.msra.mxu1 %v70_v7 }
  0x1e   :  { %86 = vmatpush.msra.mxu0 %v69_v8  ;;  %109 = vmatpush.msra.mxu1 %v69_v8 }
  0x20   :  { %87 = vmatpush.msra.mxu0 %v68_v9  ;;  %110 = vmatpush.msra.mxu1 %v68_v9 }
  0x22   :  { %88 = vmatpush.msra.mxu0 %v67_v10  ;;  %111 = vmatpush.msra.mxu1 %v67_v10 }
  0x24   :  { %89 = vmatpush.msra.mxu0 %v66_v11  ;;  %112 = vmatpush.msra.mxu1 %v66_v11 }
  0x26   :  { %90 = vmatpush.msra.mxu0 %v65_v12  ;;  %113 = vmatpush.msra.mxu1 %v65_v12 }
  0x28   :  { %91 = vmatpush.msra.mxu0 %v64_v13  ;;  %114 = vmatpush.msra.mxu1 %v64_v13 }
  0x2a   :  { %92 = vmatpush.msra.mxu0 %v63_v14  ;;  %115 = vmatpush.msra.mxu1 %v63_v14 }
  0x2c   :  { %93 = vmatpush.msra.mxu0 %v62_v15  ;;  %116 = vmatpush.msra.mxu1 %v62_v15 }
  0x2d   :  { %94 = vmatmul.f32.vlgmr.msra.gmra.mxu0 %v61_v16 }
  0xaa   :  { %v95_v17 = vpop.f32.mrf.mxu0 }
  0xab   :  { %v98_v18 = vmul.f32 0.03125, %v95_v17 }
  0xad   :  { %v99_v19 = vsub.f32 %v61_v16, %v98_v18 }
  0xaf   :  { %v100_v20 = vmul.f32 %v99_v19, %v99_v19 }
  0xb1   :  { %117 = vmatmul.f32.vlgmr.msra.gmra.mxu1 %v100_v20 }
 0x12e   :  { %v118_v21 = vpop.f32.mrf.mxu1 }
 0x12f   :  { %v121_v22 = vmul.f32 0.03125, %v118_v21 }
 0x131   :  { %v122_v23 = vadd.f32 1e-05, %v121_v22 }
 0x133   :  { %171 = vrsqrt.f32 %v122_v23  ;;  %vm129_vm1 = vweird.f32 %v122_v23 }
 0x139   :  { %v172_v24 = vpop.eup %171 }
 0x13a   :  { %v124_v25 = vmul.f32 %v172_v24, %v122_v23  ;;  %vm130_vm0 = vweird.f32 %v172_v24 }
 0x13b   :  { %vm131_vm2 = vmor %vm129_vm1, %vm130_vm0 }
 0x13c   :  { %v125_v26 = vmul.f32 %v172_v24, %v124_v25 }
 0x13e   :  { %v126_v27 = vmul.f32 0.5, %v125_v26 }
 0x140   :  { %v127_v28 = vsub.f32 1.5, %v126_v27 }
 0x142   :  { %v128_v29 = vmul.f32 %v172_v24, %v127_v28 }
 0x144   :  { %v132_v31 = vsel %vm131_vm2, %v172_v24, %v128_v29 }
 0x145   :  { %v135_v32 = vmul.f32 %v132_v31, %v99_v19 }
 0x147   :  { %v139_v34 = vmul.f32 %v169_v30, %v135_v32 }
 0x149   :  { %v143_v35 = vadd.f32 %v170_v33, %v139_v34 }
 0x14b   :  { %144 = vst [vmem:[#allocation8] sm:$0x3] %v143_v35 }
 0x14c   :  { %155 = dma.vmem_to_hbm [thread:$0]  %s151_s6, 32, %s153_s9, [#allocation4]  }
 0x14d   :  { %273 = dma.done.wait [#allocation4], 32  }
 0x14e   :  { %274 = vsyncadd [#allocation4], 4294967264 }
 0x14f   :  { %160 = vsyncpa [#allocation3], 1 }
 0x150   :  { %161 = vsyncpa [#allocation6], 1 }
 0x151   :  { %162 = vsyncpa [#allocation4], 1 }

</bundles_post_ra>
